<compile_context>
chip_gen: v7x
topology: tpu7x:2x2x1
jax: 0.10.0
libtpu: 0.0.40
codegen_flags: <defaults>
</compile_context>

<pallas_src>
import jax
import jax.numpy as jnp
from jax.experimental import pallas as pl
from jax.experimental.pallas import tpu as pltpu


def _fnn_identity_kernel(x_hbm, out_hbm, sem):
    # encode -> infer/inter -> decode are all identity: a single HBM->HBM DMA.
    cp = pltpu.make_async_copy(x_hbm, out_hbm, sem)
    cp.start()
    cp.wait()


def fnn_forward(x, w=None):
    # `w` is accepted for interface fidelity with forward(x, w) but never touched,
    # exactly like the reference (inter ignores it). It is NOT fed to the kernel,
    # so no DMA traffic is generated for it.
    del w
    out = pl.pallas_call(
        _fnn_identity_kernel,
        out_shape=jax.ShapeDtypeStruct(x.shape, x.dtype),
        in_specs=[pl.BlockSpec(memory_space=pl.ANY)],   # raw HBM ref, no auto-DMA to VMEM
        out_specs=pl.BlockSpec(memory_space=pl.ANY),    # raw HBM ref, written by the DMA
        scratch_shapes=[pltpu.SemaphoreType.DMA],
    )(x)
    # PyTorch returns (x, y) where both reference the same tensor; mirror that here
    # instead of paying for a second identical HBM write.
    return out, out


def init_fnn_params(key):
    """Deterministic init of the (unused) fc1 = nn.Linear(50, 50) parameters."""
    # TODO(synk): fc1 is dead code in the reference forward; kept for __init__ fidelity only.
    k_w, k_b = jax.random.split(key)
    bound = 1.0 / jnp.sqrt(50.0)
    fc1_weight = jax.random.uniform(k_w, (50, 50), jnp.float32, -bound, bound)
    fc1_bias = jax.random.uniform(k_b, (50,), jnp.float32, -bound, bound)
    return {"fc1_weight": fc1_weight, "fc1_bias": fc1_bias}


if __name__ == "__main__":
    key = jax.random.PRNGKey(0)
    k_params, k_x, k_w = jax.random.split(key, 3)

    params = init_fnn_params(k_params)  # mirrors __init__, unused in forward

    B, F = 8, 50
    x = jax.random.normal(k_x, (B, F), dtype=jnp.float32)
    w = jax.random.normal(k_w, (B, F), dtype=jnp.float32)

    x_out, y_out = fnn_forward(x, w)
    jax.block_until_ready((x_out, y_out))

    # Reference check: forward is identity on x for both outputs.
    assert jnp.allclose(x_out, x), "decode(encode(x)) mismatch"
    assert jnp.allclose(y_out, x), "infer/inter(z, w) mismatch"

    print("KERNEL_OK")
</pallas_src>

<mosaic_0001>
module attributes {stable_mosaic.version = 11 : i64} {
  func.func @_fnn_identity_kernel(%arg0: memref<8x50xf32, #tpu.memory_space<any>>, %arg1: memref<8x50xf32, #tpu.memory_space<any>>, %arg2: memref<!tpu.dma_semaphore, #tpu.memory_space<semaphore_mem>>) attributes {dimension_semantics = [], scalar_prefetch = 0 : i64, scratch_operands = 1 : i64, tpu.core_type = #tpu.core_type<tc>} {
    tpu.enqueue_dma source(%arg0 : memref<8x50xf32, #tpu.memory_space<any>>) target(%arg1 : memref<8x50xf32, #tpu.memory_space<any>>) target_semaphore(%arg2 : memref<!tpu.dma_semaphore, #tpu.memory_space<semaphore_mem>>)
    tpu.wait_dma2 semaphore(%arg2 : memref<!tpu.dma_semaphore, #tpu.memory_space<semaphore_mem>>) src(%arg0 : memref<8x50xf32, #tpu.memory_space<any>>) dst(%arg1 : memref<8x50xf32, #tpu.memory_space<any>>)
    return
  }
}

</mosaic_0001>

<bundles_post_ra>
// kernel: tpu_custom_call.1
= control target key start
LH: loop header
LB: loop body
LE: loop exit
PB: predicated region body
PF: predicated region fallthrough
CT: control target
= control target key end

     0   :  { %s34_s6 = smov [#allocation2]   ;;  %s35_s7 = smov [#allocation3]   ;;  %s53_s0 = inlined_call_operand.hbm [shape: f32[8,50], index: 0, kind: input, shape index: {}]   ;;  %s54_s1 = inlined_call_operand.hbm [shape: f32[8,50], index: 1, kind: output, shape index: {}]  }
   0x1   :  { %s36_s8 = smov 0  }
   0x2   :  { %18 = dma.general %s53_s0, 128, %s54_s1, %s34_s6, %s35_s7, [#allocation4], %s36_s8, 0  }
   0x3   :  { %32 = dma.done.wait [#allocation2], 128 }
   0x4   :  { %33 = vsyncadd [#allocation2], 4294967168 }
   0x5   :  { %22 = vsyncmov [#allocation2] }
   0x8   :  { %s23_s13 = vpop.sfrf %22 }
   0x9   :  { %p28_p0 = scmp.ne.s32.totalorder %s23_s13, 0 }
   0xb   :  { %27 = shalt.err (%p28_p0)  }

</bundles_post_ra>
